<compile_context>
chip_gen: v5e
topology: v5e:2x2
jax: 0.10.0
libtpu: 0.0.40
codegen_flags: <defaults>
</compile_context>

<pallas_src>
import numpy as np

import jax
import jax.numpy as jnp
from jax.experimental import pallas as pl
from jax.experimental.pallas import tpu as pltpu

LANE = 128      # TPU lane width  (last dim)
SUBLANE = 8     # TPU sublane width (second-to-last dim)
HIDDEN = 64     # hidden width of the Value MLP (fixed by the module)
MAX_TILE_B = 4096   # batch rows per grid step (sweet spot 1K-4K, tiny VMEM use)


def _round_up(n, m):
    return ((n + m - 1) // m) * m


def _pad2d(a, rows, cols):
    return jnp.pad(a, ((0, rows - a.shape[0]), (0, cols - a.shape[1])))


def _value_kernel(x_ref, w1_ref, b1_ref, w2_ref, b2_ref, wv_ref, bv_ref, out_ref):
    """One batch tile: out = tanh(tanh(x@W1+b1)@W2+b2) . wv + bv (f32)."""
    x = x_ref[...]                                              # [tb, d_in_p]
    h = jnp.tanh(jnp.dot(x, w1_ref[...],
                         preferred_element_type=jnp.float32) + b1_ref[...])
    h = jnp.tanh(jnp.dot(h, w2_ref[...],
                         preferred_element_type=jnp.float32) + b2_ref[...])
    # Value head: row vector wv [1, h_p] -> multiply + lane reduce -> [tb, 1].
    v = jnp.sum(h * wv_ref[...], axis=-1, keepdims=True) + bv_ref[...]
    out_ref[...] = v.astype(out_ref.dtype)


def _choose_tile_b(B):
    """Large tiles, but >= 2 grid steps when B > 8 (v7x has 2 TensorCores)."""
    if B <= SUBLANE:
        return _round_up(max(B, 1), SUBLANE)
    num_tiles = max(2, pl.cdiv(B, MAX_TILE_B))
    return _round_up(pl.cdiv(B, num_tiles), SUBLANE)


def value_forward(x, params, *, min_pallas_batch=256):
    """x: [B, num_inputs] f32.  Returns state values [B, 1] f32."""
    B, d_in = x.shape
    assert params["affine1.weight"].shape[0] == d_in

    if B < min_pallas_batch:
        # Launch overhead dwarfs the work at small batches -> pure JAX.
        return value_forward_ref(x.astype(jnp.float32), params)

    # Padded dims: d_in only to a sublane multiple (8), hidden to a lane (128).
    d_in_p = _round_up(d_in, SUBLANE)
    h_p = _round_up(HIDDEN, LANE)

    tile_b = _choose_tile_b(B)
    b_p = _round_up(B, tile_b)
    grid = (pl.cdiv(b_p, tile_b),)

    x_p = _pad2d(x.astype(jnp.float32), b_p, d_in_p)
    w1 = _pad2d(params["affine1.weight"], d_in_p, h_p)
    b1 = _pad2d(params["affine1.bias"], 1, h_p)
    w2 = _pad2d(params["affine2.weight"], h_p, h_p)
    b2 = _pad2d(params["affine2.bias"], 1, h_p)
    # value_head weight stored as [HIDDEN, 1]; use it as a [1, h_p] row vector.
    wv = _pad2d(params["value_head.weight"].reshape(1, HIDDEN), 1, h_p)
    bv = params["value_head.bias"].reshape(1, 1)

    x_spec = pl.BlockSpec((tile_b, d_in_p), lambda i: (i, 0))
    out_spec = pl.BlockSpec((tile_b, 1), lambda i: (i, 0))

    def const_spec(shape):  # weights/biases: same block every grid step
        return pl.BlockSpec(shape, lambda i: (0, 0))

    # Cost / VMEM budgets for the de-padded shapes (f32 = 4 bytes).
    param_elems = w1.size + b1.size + w2.size + b2.size + wv.size + bv.size
    flops = 2 * b_p * (d_in_p * h_p + h_p * h_p + h_p)
    transcendentals = 2 * b_p * h_p
    bytes_accessed = 4 * (b_p * d_in_p + b_p * 1 + param_elems)
    tile_elems = tile_b * (d_in_p + 1)            # x tile + out tile
    vmem_bytes = 4 * (2 * tile_elems + 2 * param_elems) + (2 << 20)
    vmem_bytes = min(int(vmem_bytes), 64 << 20)

    out = pl.pallas_call(
        _value_kernel,
        out_shape=jax.ShapeDtypeStruct((b_p, 1), jnp.float32),
        grid=grid,
        in_specs=[
            x_spec,
            const_spec((d_in_p, h_p)), const_spec((1, h_p)),
            const_spec((h_p, h_p)), const_spec((1, h_p)),
            const_spec((1, h_p)), const_spec((1, 1)),
        ],
        out_specs=out_spec,
        compiler_params=pltpu.CompilerParams(
            dimension_semantics=("parallel",),
            vmem_limit_bytes=vmem_bytes,
        ),
        cost_estimate=pl.CostEstimate(
            flops=int(flops),
            transcendentals=int(transcendentals),
            bytes_accessed=int(bytes_accessed),
        ),
    )(x_p, w1, b1, w2, b2, wv, bv)

    return out[:B, :]


def init_value_params(key, num_inputs):
    """Mimics the torch module: nn.Linear default uniform(-1/sqrt(fan_in), +)
    for all layers, then value_head.weight *= 0.1 and value_head.bias = 0.
    Weights stored as [in, out] (transposed vs torch's [out, in])."""
    k1, k2, k3, k4, k5, k6 = jax.random.split(key, 6)

    def linear(kw, kb, fan_in, fan_out):
        bound = 1.0 / float(np.sqrt(fan_in))
        w = jax.random.uniform(kw, (fan_in, fan_out), jnp.float32, -bound, bound)
        b = jax.random.uniform(kb, (1, fan_out), jnp.float32, -bound, bound)
        return w, b

    w1, b1 = linear(k1, k2, num_inputs, HIDDEN)
    w2, b2 = linear(k3, k4, HIDDEN, HIDDEN)
    wv, _ = linear(k5, k6, HIDDEN, 1)
    return {
        "affine1.weight": w1, "affine1.bias": b1,
        "affine2.weight": w2, "affine2.bias": b2,
        "value_head.weight": wv * 0.1,
        "value_head.bias": jnp.zeros((1, 1), jnp.float32),
    }


def value_forward_ref(x, params):
    """Pure-JAX reference of the torch forward."""
    h = jnp.tanh(x @ params["affine1.weight"] + params["affine1.bias"])
    h = jnp.tanh(h @ params["affine2.weight"] + params["affine2.bias"])
    return h @ params["value_head.weight"] + params["value_head.bias"]


if __name__ == "__main__":
    num_inputs = 16

    key = jax.random.PRNGKey(0)
    kx1, kx2, kp = jax.random.split(key, 3)
    params = init_value_params(kp, num_inputs)

    # 1) Small batch, forced through the Pallas kernel (single grid step).
    x_small = jax.random.normal(kx1, (8, num_inputs), jnp.float32)
    v_small = value_forward(x_small, params, min_pallas_batch=0)
    jax.block_until_ready(v_small)
    np.testing.assert_allclose(np.asarray(v_small),
                               np.asarray(value_forward_ref(x_small, params)),
                               rtol=1e-5, atol=1e-5)

    # 2) Larger batch: >= 2 grid steps (exercises the tiled / megacore path).
    x_big = jax.random.normal(kx2, (1024, num_inputs), jnp.float32)
    v_big = value_forward(x_big, params)
    jax.block_until_ready(v_big)
    np.testing.assert_allclose(np.asarray(v_big),
                               np.asarray(value_forward_ref(x_big, params)),
                               rtol=1e-5, atol=1e-5)

    print("KERNEL_OK")
</pallas_src>

<mosaic_0001>
module attributes {stable_mosaic.version = 11 : i64} {
  func.func @_value_kernel(%arg0: i32, %arg1: memref<8x16xf32, #tpu.memory_space<vmem>>, %arg2: memref<16x128xf32, #tpu.memory_space<vmem>>, %arg3: memref<1x128xf32, #tpu.memory_space<vmem>>, %arg4: memref<128x128xf32, #tpu.memory_space<vmem>>, %arg5: memref<1x128xf32, #tpu.memory_space<vmem>>, %arg6: memref<1x128xf32, #tpu.memory_space<vmem>>, %arg7: memref<1x1xf32, #tpu.memory_space<vmem>>, %arg8: memref<8x1xf32, #tpu.memory_space<vmem>>) attributes {dimension_semantics = [#tpu.dimension_semantics<parallel>], iteration_bounds = array<i64: 1>, scalar_prefetch = 0 : i64, scratch_operands = 0 : i64, tpu.core_type = #tpu.core_type<tc>, window_params = [{transform_indices = @transform_0, window_bounds = array<i64: 8, 16>}, {pipeline_mode = #tpu.pipeline_mode<synchronous>, transform_indices = @transform_1, window_bounds = array<i64: 16, 128>}, {pipeline_mode = #tpu.pipeline_mode<synchronous>, transform_indices = @transform_2, window_bounds = array<i64: 1, 128>}, {pipeline_mode = #tpu.pipeline_mode<synchronous>, transform_indices = @transform_3, window_bounds = array<i64: 128, 128>}, {pipeline_mode = #tpu.pipeline_mode<synchronous>, transform_indices = @transform_4, window_bounds = array<i64: 1, 128>}, {pipeline_mode = #tpu.pipeline_mode<synchronous>, transform_indices = @transform_5, window_bounds = array<i64: 1, 128>}, {pipeline_mode = #tpu.pipeline_mode<synchronous>, transform_indices = @transform_6, window_bounds = array<i64: 1, 1>}, {transform_indices = @transform_7, window_bounds = array<i64: 8, 1>}]} {
    %c0 = arith.constant 0 : index
    %c0_0 = arith.constant 0 : index
    %0 = vector.load %arg1[%c0, %c0_0] : memref<8x16xf32, #tpu.memory_space<vmem>>, vector<8x16xf32>
    %c0_1 = arith.constant 0 : index
    %c0_2 = arith.constant 0 : index
    %1 = vector.load %arg2[%c0_1, %c0_2] : memref<16x128xf32, #tpu.memory_space<vmem>>, vector<16x128xf32>
    %cst = arith.constant dense<0.000000e+00> : vector<8x128xf32>
    %2 = tpu.matmul %0, %1, %cst {dimension_numbers = #tpu.dot_dimension_numbers<[1], [0], [0], [1], [0, 0, 1, 1], [], []>} : vector<8x16xf32>, vector<16x128xf32>, vector<8x128xf32> -> vector<8x128xf32>
    %c0_3 = arith.constant 0 : index
    %c0_4 = arith.constant 0 : index
    %3 = vector.load %arg3[%c0_3, %c0_4] : memref<1x128xf32, #tpu.memory_space<vmem>>, vector<1x128xf32>
    %4 = vector.broadcast %3 : vector<1x128xf32> to vector<8x128xf32>
    %5 = arith.addf %2, %4 : vector<8x128xf32>
    %6 = math.tanh %5 : vector<8x128xf32>
    %c0_5 = arith.constant 0 : index
    %c0_6 = arith.constant 0 : index
    %7 = vector.load %arg4[%c0_5, %c0_6] : memref<128x128xf32, #tpu.memory_space<vmem>>, vector<128x128xf32>
    %cst_7 = arith.constant dense<0.000000e+00> : vector<8x128xf32>
    %8 = tpu.matmul %6, %7, %cst_7 {dimension_numbers = #tpu.dot_dimension_numbers<[1], [0], [0], [1], [0, 0, 1, 1], [], []>} : vector<8x128xf32>, vector<128x128xf32>, vector<8x128xf32> -> vector<8x128xf32>
    %c0_8 = arith.constant 0 : index
    %c0_9 = arith.constant 0 : index
    %9 = vector.load %arg5[%c0_8, %c0_9] : memref<1x128xf32, #tpu.memory_space<vmem>>, vector<1x128xf32>
    %10 = vector.broadcast %9 : vector<1x128xf32> to vector<8x128xf32>
    %11 = arith.addf %8, %10 : vector<8x128xf32>
    %12 = math.tanh %11 : vector<8x128xf32>
    %c0_10 = arith.constant 0 : index
    %c0_11 = arith.constant 0 : index
    %13 = vector.load %arg6[%c0_10, %c0_11] : memref<1x128xf32, #tpu.memory_space<vmem>>, vector<1x128xf32>
    %14 = vector.broadcast %13 : vector<1x128xf32> to vector<8x128xf32>
    %15 = arith.mulf %12, %14 : vector<8x128xf32>
    %cst_12 = arith.constant dense<0.000000e+00> : vector<8xf32>
    %16 = vector.multi_reduction <add>, %15, %cst_12 [1] : vector<8x128xf32> to vector<8xf32>
    %17 = vector.shape_cast %16 : vector<8xf32> to vector<8x1xf32>
    %c0_13 = arith.constant 0 : index
    %c0_14 = arith.constant 0 : index
    %18 = vector.load %arg7[%c0_13, %c0_14] : memref<1x1xf32, #tpu.memory_space<vmem>>, vector<1x1xf32>
    %19 = vector.broadcast %18 : vector<1x1xf32> to vector<8x1xf32>
    %20 = arith.addf %17, %19 : vector<8x1xf32>
    %c0_15 = arith.constant 0 : index
    %c0_16 = arith.constant 0 : index
    %21 = vector.load %arg8[%c0_15, %c0_16] : memref<8x1xf32, #tpu.memory_space<vmem>>, vector<8x1xf32>
    tpu.vector_store %arg8[%c0_15, %c0_16], %20 {strides = array<i32>} : memref<8x1xf32, #tpu.memory_space<vmem>>, vector<8x1xf32>,
    return
  }
  func.func @transform_0(%arg0: i32) -> (i32, i32) {
    %c0_i32 = arith.constant 0 : i32
    %c0_i32_0 = arith.constant 0 : i32
    return %arg0, %c0_i32 : i32, i32
  }
  func.func @transform_1(%arg0: i32) -> (i32, i32) {
    %c0_i32 = arith.constant 0 : i32
    %c0_i32_0 = arith.constant 0 : i32
    %c0_i32_1 = arith.constant 0 : i32
    return %c0_i32, %c0_i32_0 : i32, i32
  }
  func.func @transform_2(%arg0: i32) -> (i32, i32) {
    %c0_i32 = arith.constant 0 : i32
    %c0_i32_0 = arith.constant 0 : i32
    %c0_i32_1 = arith.constant 0 : i32
    return %c0_i32, %c0_i32_0 : i32, i32
  }
  func.func @transform_3(%arg0: i32) -> (i32, i32) {
    %c0_i32 = arith.constant 0 : i32
    %c0_i32_0 = arith.constant 0 : i32
    %c0_i32_1 = arith.constant 0 : i32
    return %c0_i32, %c0_i32_0 : i32, i32
  }
  func.func @transform_4(%arg0: i32) -> (i32, i32) {
    %c0_i32 = arith.constant 0 : i32
    %c0_i32_0 = arith.constant 0 : i32
    %c0_i32_1 = arith.constant 0 : i32
    return %c0_i32, %c0_i32_0 : i32, i32
  }
  func.func @transform_5(%arg0: i32) -> (i32, i32) {
    %c0_i32 = arith.constant 0 : i32
    %c0_i32_0 = arith.constant 0 : i32
    %c0_i32_1 = arith.constant 0 : i32
    return %c0_i32, %c0_i32_0 : i32, i32
  }
  func.func @transform_6(%arg0: i32) -> (i32, i32) {
    %c0_i32 = arith.constant 0 : i32
    %c0_i32_0 = arith.constant 0 : i32
    %c0_i32_1 = arith.constant 0 : i32
    return %c0_i32, %c0_i32_0 : i32, i32
  }
  func.func @transform_7(%arg0: i32) -> (i32, i32) {
    %c0_i32 = arith.constant 0 : i32
    %c0_i32_0 = arith.constant 0 : i32
    return %arg0, %c0_i32 : i32, i32
  }
}

</mosaic_0001>

<bundles_post_ra>
// kernel: tpu_custom_call.1
= control target key start
LH: loop header
LB: loop body
LE: loop exit
PB: predicated region body
PF: predicated region fallthrough
CT: control target
= control target key end

     0   :  { %s325_s0 = inlined_call_operand.hbm [shape: f32[8,16], index: 0, kind: input, shape index: {}]   ;;  %s326_s1 = inlined_call_operand.hbm [shape: f32[16,128], index: 1, kind: input, shape index: {}]   ;;  %s327_s2 = inlined_call_operand.vmem [shape: f32[1,128], index: 2, kind: input, shape index: {}]   ;;  %s328_s3 = inlined_call_operand.hbm [shape: f32[128,128], index: 3, kind: input, shape index: {}]   ;;  %s329_s4 = inlined_call_operand.vmem [shape: f32[1,128], index: 4, kind: input, shape index: {}]   ;;  %s330_s5 = inlined_call_operand.vmem [shape: f32[1,128], index: 5, kind: input, shape index: {}]   ;;  %s331_s6 = inlined_call_operand.<no memory space> [shape: f32[1,1], index: 6, kind: input, shape index: {}]   ;;  %s332_s7 = inlined_call_operand.vmem [shape: f32[8,1], index: 7, kind: output, shape index: {}]  }
   0x1   :  { %v12_v0 = vstv %s331_s6 }
   0x2   :  { %13 = vst [vmem:[#allocation2] sm:$0x1] %v12_v0 }
   0x3   :  { %14 = vsyncpa [#allocation4], 0 }
   0x4   :  { %15 = vsyncpa [#allocation6], 0  ;;  %s31_s28 = sshll.u32 %s326_s1, 4  ;;  %s256_s29 = smov [#allocation5]   ;;  %s32_s28 = int_to_ptr.hbm [resolvable:$true] %s31_s28 }
   0x5   :  { %s33_s30 = sshll.u32 %s256_s29, 4  ;;  %s21_s10 = sshll.u32 %s325_s0, 4  ;;  %s34_s30 = int_to_ptr.vmem [resolvable:$true] %s33_s30  ;;  %s22_s10 = int_to_ptr.hbm [resolvable:$true] %s21_s10 }
   0x6   :  { %s257_s11 = smov 128   ;;  %s258_s12 = smov 8  }
   0x7   :  { %39 = dma.hbm_to_vmem [thread:$0]  %s32_s28, 256, %s34_s30, [#allocation6], %s257_s11, %s257_s11, %s258_s12  }
   0x8   :  { %s259_s6 = smov [#allocation3]   ;;  %s46_s16 = sshll.u32 %s328_s3, 4  ;;  %s47_s16 = int_to_ptr.hbm [resolvable:$true] %s46_s16 }
   0x9   :  { %s23_s13 = sshll.u32 %s259_s6, 4  ;;  %s260_s1 = smov [#allocation7]   ;;  %s24_s13 = int_to_ptr.vmem [resolvable:$true] %s23_s13 }
   0xa   :  { %26 = dma.hbm_to_vmem [thread:$0]  %s22_s10, 128, %s24_s13, [#allocation4]  }
   0xb   :  { %s48_s17 = sshll.u32 %s260_s1, 4  ;;  %s49_s17 = int_to_ptr.vmem [resolvable:$true] %s48_s17 }
   0xc   :  { %54 = dma.hbm_to_vmem [thread:$0]  %s47_s16, 2048, %s49_s17, [#allocation6], %s257_s11, %s257_s11, %s258_s12  }
   0xd   :  { %252 = dma.done.wait [#allocation4], 128  }
   0xe   :  { %253 = vsyncadd [#allocation4], 4294967168 }
   0xf   :  { %254 = dma.done.wait [#allocation6], 2304  }
  0x10   :  { %255 = vsyncadd [#allocation6], 4294964992  ;;  %v75_v1 = vld [vmem:[#allocation5 + $0x8] sm:$0xff]  ;;  %v74_v2 = vld [vmem:[#allocation5] sm:$0xff]  ;;  %vm80_vm0 = vcmask 130048   ;;  %vm158_vm1 = vcmask 7168  }
  0x11   :  { %98 = vmatpush.msra.mxu0 %v75_v1  ;;  %v73_v3 = vld [vmem:[#allocation3] sm:$0xff]  ;;  %v120_v4 = vld [vmem:[#allocation7 + $0x78] sm:$0xff]  ;;  %v119_v5 = vld [vmem:[#allocation7 + $0x70] sm:$0xff] }
  0x12   :  { %125 = vmatpush.msra.mxu1 %v120_v4  ;;  %v118_v6 = vld [vmem:[#allocation7 + $0x68] sm:$0xff]  ;;  %v117_v7 = vld [vmem:[#allocation7 + $0x60] sm:$0xff]  ;;  %v116_v8 = vld [vmem:[#allocation7 + $0x58] sm:$0xff] }
  0x13   :  { %99 = vmatpush.msra.mxu0 %v74_v2  ;;  %v115_v9 = vld [vmem:[#allocation7 + $0x50] sm:$0xff]  ;;  %v114_v10 = vld [vmem:[#allocation7 + $0x48] sm:$0xff]  ;;  %v113_v11 = vld [vmem:[#allocation7 + $0x40] sm:$0xff] }
  0x14   :  { %166 = vmatmul.msk.f32.vlgmr.msra.gmra.mxu0 %vm80_vm0, %v73_v3  ;;  %126 = vmatpush.msra.mxu1 %v119_v5  ;;  %v112_v12 = vld [vmem:[#allocation7 + $0x38] sm:$0xff]  ;;  %v111_v13 = vld [vmem:[#allocation7 + $0x30] sm:$0xff]  ;;  %v110_v14 = vld [vmem:[#allocation7 + $0x28] sm:$0xff] }
  0x15   :  { %v109_v15 = vld [vmem:[#allocation7 + $0x20] sm:$0xff]  ;;  %v108_v16 = vld [vmem:[#allocation7 + $0x18] sm:$0xff]  ;;  %v107_v17 = vld [vmem:[#allocation7 + $0x10] sm:$0xff] }
  0x16   :  { %127 = vmatpush.msra.mxu1 %v118_v6  ;;  %v106_v18 = vld [vmem:[#allocation7 + $0x8] sm:$0xff]  ;;  %v105_v19 = vld [vmem:[#allocation7] sm:$0xff] }
  0x17   :  { %v172_v20 = vld [vmem:[%s327_s2] ss:$0 sm:$0xff] }
  0x18   :  { %128 = vmatpush.msra.mxu1 %v117_v7  ;;  %v173_v24 = vld [vmem:[%s329_s4] ss:$0 sm:$0xff] }
  0x19   :  { %v174_v27 = vld [vmem:[%s330_s5] ss:$0 sm:$0xff] }
  0x1a   :  { %129 = vmatpush.msra.mxu1 %v116_v8  ;;  %v175_v30 = vld [vmem:[#allocation2] ss:$0 sm:$0xff] }
  0x1c   :  { %130 = vmatpush.msra.mxu1 %v115_v9 }
  0x1e   :  { %131 = vmatpush.msra.mxu1 %v114_v10 }
  0x20   :  { %132 = vmatpush.msra.mxu1 %v113_v11 }
  0x22   :  { %133 = vmatpush.msra.mxu1 %v112_v12 }
  0x24   :  { %134 = vmatpush.msra.mxu1 %v111_v13 }
  0x26   :  { %135 = vmatpush.msra.mxu1 %v110_v14 }
  0x28   :  { %136 = vmatpush.msra.mxu1 %v109_v15 }
  0x2a   :  { %137 = vmatpush.msra.mxu1 %v108_v16 }
  0x2c   :  { %138 = vmatpush.msra.mxu1 %v107_v17 }
  0x2e   :  { %139 = vmatpush.msra.mxu1 %v106_v18 }
  0x30   :  { %140 = vmatpush.msra.mxu1 %v105_v19 }
  0x91   :  { %v101_v21 = vpop.f32.mrf.mxu0 }
  0x92   :  { %v102_v22 = vadd.f32 %v172_v20, %v101_v21 }
  0x94   :  { %176 = vtanh.f32 %v102_v22 }
  0x9a   :  { %v177_v23 = vpop.eup %176 }
  0x9b   :  { %141 = vmatmul.f32.vlgmr.msra.gmra.mxu1 %v177_v23 }
 0x118   :  { %v142_v25 = vpop.f32.mrf.mxu1 }
 0x119   :  { %v143_v26 = vadd.f32 %v173_v24, %v142_v25 }
 0x11b   :  { %178 = vtanh.f32 %v143_v26 }
 0x121   :  { %v179_v28 = vpop.eup %178 }
 0x122   :  { %v150_v29 = vmul.f32 %v179_v28, %v174_v27 }
 0x124   :  { %151 = vadd.xlane.f32.xlu0 %v150_v29 }
 0x197   :  { %v152_v31 = vpop.xlane.xlu0 %151 }
 0x198   :  { %v157_v32 = vadd.f32 %v175_v30, %v152_v31 }
 0x19a   :  { %159 = vst.msk [vmem:[%s332_s7] sm:$0xff] %vm158_vm1, %v157_v32 }
 0x19b   :  { %164 = vsyncpa [#allocation4], 1 }
 0x19c   :  { %165 = vsyncpa [#allocation6], 1 }

</bundles_post_ra>
